<compile_context>
chip_gen: v7x
topology: tpu7x:2x2x1
jax: 0.10.0
libtpu: 0.0.40
codegen_flags: <defaults>
</compile_context>

<pallas_src>
import jax
import jax.numpy as jnp
from jax.experimental import pallas as pl
from jax.experimental.pallas import tpu as pltpu

C_IN, C_MID, C_OUT = 30, 16, 32


def fused_1x1_conv_kernel(x_ref, w_ref, b_ref, o_ref):
    # x_ref: (C_IN, tm)    pixels on the lane axis
    # w_ref: (C_OUT, C_IN) composed weight W2 @ W1
    # b_ref: (C_OUT, 1)    composed bias   W2 @ b1 + b2
    # o_ref: (C_OUT, tm)
    y = jnp.dot(w_ref[...], x_ref[...], preferred_element_type=jnp.float32)
    o_ref[...] = (y + b_ref[...]).astype(o_ref.dtype)


def _pick_tile(R, N, tm):
    """Pick a lane-dim tile: multiple of 128 (or full extent), large, and
    guaranteeing >=2 tiles along R when N == 1 (v7x megacore)."""
    tm = min(tm, R)
    if tm != R and tm % 128 != 0:
        tm = max(128, (tm // 128) * 128)
    if N == 1 and tm >= R and R >= 256:
        half = (R // 2 // 128) * 128
        if half >= 128:
            tm = half
    return max(tm, 1)


def fused_1x1_convs(x_ncr, w_eff, b_eff, *, tm=8192):
    """x_ncr: (N, C_IN, R) -> (N, C_OUT, R).  Channel-first, no transposes."""
    N, C, R = x_ncr.shape
    assert C == C_IN
    tm = _pick_tile(R, N, tm)
    grid = (N, pl.cdiv(R, tm))

    # Per-step double-buffered working set (x + y tiles); weights negligible.
    itemsize = jnp.dtype(x_ncr.dtype).itemsize
    per_step = (C_IN + C_OUT) * tm * itemsize
    vmem_limit = int(min(64 * 1024 * 1024, max(32 * 1024 * 1024, 4 * per_step)))

    return pl.pallas_call(
        fused_1x1_conv_kernel,
        out_shape=jax.ShapeDtypeStruct((N, C_OUT, R), x_ncr.dtype),
        grid_spec=pltpu.PrefetchScalarGridSpec(
            num_scalar_prefetch=0,
            grid=grid,
            in_specs=[
                # (None, ...) squeezes the batch dim inside the kernel.
                pl.BlockSpec((None, C_IN, tm), lambda n, i: (n, 0, i)),
                # Constant index_map -> weight/bias DMA'd once, reused.
                pl.BlockSpec((C_OUT, C_IN), lambda n, i: (0, 0)),
                pl.BlockSpec((C_OUT, 1), lambda n, i: (0, 0)),
            ],
            out_specs=pl.BlockSpec((None, C_OUT, tm), lambda n, i: (n, 0, i)),
        ),
        compiler_params=pltpu.CompilerParams(
            dimension_semantics=("parallel", "parallel"),
            vmem_limit_bytes=vmem_limit,
        ),
    )(x_ncr, w_eff, b_eff)


def compose_params(params):
    """Fold conv2(conv1(x)) into a single affine map (exact linear algebra).
    Call ONCE ahead of time; do not re-run per forward."""
    w1, b1, w2, b2 = params  # PyTorch layout: w (C_out, C_in), b (C_out,)
    w_eff = w2 @ w1                                             # (C_OUT, C_IN)
    b_eff = (w2 @ b1.reshape(C_MID, 1)) + b2.reshape(C_OUT, 1)  # (C_OUT, 1)
    return w_eff, b_eff


def model_forward(x_nchw, w_eff, b_eff, *, tm=8192):
    """Equivalent of Model.forward: conv1 (1x1) then conv2 (1x1)."""
    N, C, H, W = x_nchw.shape
    assert C == C_IN
    x_ncr = x_nchw.reshape(N, C_IN, H * W)        # free reshape (no transpose)
    y_ncr = fused_1x1_convs(x_ncr, w_eff, b_eff, tm=tm)
    return y_ncr.reshape(N, C_OUT, H, W)          # free reshape back to NCHW


def init_params(key):
    # PyTorch Conv2d default init: U(-bound, bound), bound = 1/sqrt(fan_in),
    # fan_in = C_in * kh * kw (kh = kw = 1).  Weights kept in PyTorch
    # (C_out, C_in) layout; composition happens in compose_params.
    k1, k2, k3, k4 = jax.random.split(key, 4)
    bound1 = 1.0 / jnp.sqrt(C_IN)
    bound2 = 1.0 / jnp.sqrt(C_MID)
    w1 = jax.random.uniform(k1, (C_MID, C_IN), jnp.float32, -bound1, bound1)
    b1 = jax.random.uniform(k2, (C_MID,), jnp.float32, -bound1, bound1)
    w2 = jax.random.uniform(k3, (C_OUT, C_MID), jnp.float32, -bound2, bound2)
    b2 = jax.random.uniform(k4, (C_OUT,), jnp.float32, -bound2, bound2)
    return w1, b1, w2, b2


if __name__ == "__main__":
    key = jax.random.PRNGKey(0)
    kx, kp = jax.random.split(key)
    # Same shape as the original module's example input: (1, 30, 64, 64).
    N, H, W = 1, 64, 64
    x = jax.random.normal(kx, (N, C_IN, H, W), dtype=jnp.float32)
    params = init_params(kp)

    # Compose the two convs into one affine map ONCE (hoisted out of the
    # per-call path), then jit the forward so the fold stays device-resident.
    w_eff, b_eff = compose_params(params)
    fwd = jax.jit(lambda xi, wi, bi: model_forward(xi, wi, bi, tm=8192))

    out = fwd(x, w_eff, b_eff)
    out = jax.block_until_ready(out)

    # Reference: the original two-conv (un-fused) math in plain JAX.
    # NOTE: folding W2@W1 changes FP association -> match to ~1e-4, not bitwise.
    w1, b1, w2, b2 = params
    x_rows = x.reshape(N, C_IN, H * W)
    y1 = jnp.einsum("oc,ncr->nor", w1, x_rows) + b1[None, :, None]
    y2 = jnp.einsum("oc,ncr->nor", w2, y1) + b2[None, :, None]
    ref = y2.reshape(N, C_OUT, H, W)

    assert out.shape == (N, C_OUT, H, W)
    assert jnp.allclose(out, ref, atol=1e-4, rtol=1e-4)

    print("KERNEL_OK")
</pallas_src>

<mosaic_0001>
module attributes {stable_mosaic.version = 11 : i64} {
  func.func @fused_1x1_conv_kernel(%arg0: i32, %arg1: i32, %arg2: memref<1x30x2048xf32, #tpu.memory_space<vmem>>, %arg3: memref<32x30xf32, #tpu.memory_space<vmem>>, %arg4: memref<32x1xf32, #tpu.memory_space<vmem>>, %arg5: memref<1x32x2048xf32, #tpu.memory_space<vmem>>) attributes {dimension_semantics = [#tpu.dimension_semantics<parallel>, #tpu.dimension_semantics<parallel>], iteration_bounds = array<i64: 1, 2>, scalar_prefetch = 0 : i64, scratch_operands = 0 : i64, tpu.core_type = #tpu.core_type<tc>, window_params = [{transform_indices = @transform_0, window_bounds = array<i64: 1, 30, 2048>}, {pipeline_mode = #tpu.pipeline_mode<synchronous>, transform_indices = @transform_1, window_bounds = array<i64: 32, 30>}, {pipeline_mode = #tpu.pipeline_mode<synchronous>, transform_indices = @transform_2, window_bounds = array<i64: 32, 1>}, {transform_indices = @transform_3, window_bounds = array<i64: 1, 32, 2048>}]} {
    %c0 = arith.constant 0 : index
    %c0_0 = arith.constant 0 : index
    %0 = vector.load %arg3[%c0, %c0_0] : memref<32x30xf32, #tpu.memory_space<vmem>>, vector<32x30xf32>
    %c0_1 = arith.constant 0 : index
    %c0_2 = arith.constant 0 : index
    %c0_3 = arith.constant 0 : index
    %1 = vector.load %arg2[%c0_1, %c0_2, %c0_3] : memref<1x30x2048xf32, #tpu.memory_space<vmem>>, vector<1x30x2048xf32>
    %2 = vector.shape_cast %1 : vector<1x30x2048xf32> to vector<30x2048xf32>
    %cst = arith.constant dense<0.000000e+00> : vector<32x2048xf32>
    %3 = tpu.matmul %0, %2, %cst {dimension_numbers = #tpu.dot_dimension_numbers<[1], [0], [0], [1], [0, 0, 1, 1], [], []>} : vector<32x30xf32>, vector<30x2048xf32>, vector<32x2048xf32> -> vector<32x2048xf32>
    %c0_4 = arith.constant 0 : index
    %c0_5 = arith.constant 0 : index
    %4 = vector.load %arg4[%c0_4, %c0_5] : memref<32x1xf32, #tpu.memory_space<vmem>>, vector<32x1xf32>
    %5 = vector.broadcast %4 : vector<32x1xf32> to vector<32x2048xf32>
    %6 = arith.addf %3, %5 : vector<32x2048xf32>
    %c0_6 = arith.constant 0 : index
    %c0_7 = arith.constant 0 : index
    %c0_8 = arith.constant 0 : index
    %7 = vector.load %arg5[%c0_6, %c0_7, %c0_8] : memref<1x32x2048xf32, #tpu.memory_space<vmem>>, vector<1x32x2048xf32>
    %8 = vector.shape_cast %7 : vector<1x32x2048xf32> to vector<32x2048xf32>
    %9 = vector.shape_cast %6 : vector<32x2048xf32> to vector<1x32x2048xf32>
    tpu.vector_store %arg5[%c0_6, %c0_7, %c0_8], %9 {strides = array<i32>} : memref<1x32x2048xf32, #tpu.memory_space<vmem>>, vector<1x32x2048xf32>,
    return
  }
  func.func @transform_0(%arg0: i32, %arg1: i32) -> (i32, i32, i32) {
    %c0_i32 = arith.constant 0 : i32
    %c0_i32_0 = arith.constant 0 : i32
    return %arg0, %c0_i32, %arg1 : i32, i32, i32
  }
  func.func @transform_1(%arg0: i32, %arg1: i32) -> (i32, i32) {
    %c0_i32 = arith.constant 0 : i32
    %c0_i32_0 = arith.constant 0 : i32
    %c0_i32_1 = arith.constant 0 : i32
    return %c0_i32, %c0_i32_0 : i32, i32
  }
  func.func @transform_2(%arg0: i32, %arg1: i32) -> (i32, i32) {
    %c0_i32 = arith.constant 0 : i32
    %c0_i32_0 = arith.constant 0 : i32
    %c0_i32_1 = arith.constant 0 : i32
    return %c0_i32, %c0_i32_0 : i32, i32
  }
  func.func @transform_3(%arg0: i32, %arg1: i32) -> (i32, i32, i32) {
    %c0_i32 = arith.constant 0 : i32
    %c0_i32_0 = arith.constant 0 : i32
    return %arg0, %c0_i32, %arg1 : i32, i32, i32
  }
}

</mosaic_0001>

<bundles_post_ra>
// kernel: _lambda_.1
= control target key start
LH: loop header
LB: loop body
LE: loop exit
PB: predicated region body
PF: predicated region fallthrough
CT: control target
= control target key end

     0   :  { %s1740_s12 = smov 0   ;;  %s1742_s13 = smov 0   ;;  %s2446_s0 = inlined_call_operand.vmem [shape: f32[1,30,4096], index: 0, kind: input, shape index: {}]   ;;  %s2447_s1 = inlined_call_operand.vmem [shape: f32[32,30], index: 1, kind: input, shape index: {}]   ;;  %s2448_s2 = inlined_call_operand.vmem [shape: f32[32,1], index: 2, kind: input, shape index: {}]   ;;  %s2449_s3 = inlined_call_operand.vmem [shape: f32[1,32,4096], index: 3, kind: output, shape index: {}]  }
   0x1   :  { %s1744_s14 = smov 0   ;;  %s1746_s15 = smov 0  }
   0x2   :  { %s1748_s16 = smov 0  }
   0x3 LB: > { %s22_s17 = sadd.s32 1, %s1711_s15  ;;  %s1487_s18 = sadd.s32 4294967295, %s1715_s16   ;;  %s1715_s16 = sphi %s1748_s16, %s13_s16   ;;  %s1711_s15 = sphi %s1746_s15, %s2456_s15   ;;  %s1707_s14 = sphi %s1744_s14, %s2455_s14   ;;  %s1703_s13 = sphi %s1742_s13, %s2454_s13   ;;  %s1699_s12 = sphi %s1740_s12, %s2453_s12  }
   0x4   : > { %p23_p0 = scmp.ge.s32.totalorder %s22_s17, 2  ;;  %p41_p1 = scmp.ne.s32.totalorder %s1703_s13, %s1699_s12 }
   0x5   : > { %p42_p2 = scmp.eq.s32.totalorder %s1715_s16, 0  ;;  %p115_p4 = scmp.eq.s32.totalorder %s1487_s18, 1 }
   0x6   : > { %s2458_s17 = smov (%p23_p0, %s22_s17), 0  ;;  %s34_s20 = sadd.s32 1, %s1703_s13 }
   0x7   : > { %p43_p3 = por %p42_p2, %p41_p1  ;;  %s30_s19 = ssub.s32 %s1711_s15, %s2458_s17 }
   0x8   : > { %p32_p5 = scmp.eq.s32.totalorder %s30_s19, 0  ;;  %p1775_p6 = por %p115_p4, %p41_p1 }
   0x9   : > { %p1490_p7 = scmp.ge.s32.totalorder %s1715_s16, 2 }
   0xa   : > { %s1780_s22 = scalar_select %p32_p5, %s1703_s13, %s34_s20  }
   0xb   : > { %143 = sbr.rel (%p1490_p7) target bundleno = 54 (0x36), region = 24 }
  0x12   : > { %146 = sbr.rel (!%p43_p3) target bundleno = 54 (0x36), region = 28  ;;  %s148_s23 = sand.u32 (%p43_p3), 1, %s1703_s13  }
  0x13   : > { %s1550_s24 = sshll.u32 (%p43_p3), %s1711_s15, 7  ;;  %s1491_s25 = sshll.u32 (%p43_p3), %s148_s23, 9 }
  0x14   : > { %s1788_s28 = scalar_lea.vmem (%p43_p3), %s2446_s0, %s1550_s24  ;;  %s1793_s29 = scalar_lea.vmem (%p43_p3), [#allocation2], %s1491_s25 }
  0x15   : > { %v168_v0 = vld [vmem:[%s1788_s28] sm:$0xff] (%p43_p3)  ;;  %v170_v1 = vld [vmem:[%s1788_s28 + $0x8] sm:$0xff] (%p43_p3)  ;;  %v172_v2 = vld [vmem:[%s1788_s28 + $0x10] sm:$0xff] (%p43_p3) }
  0x16   : > { %169 = vst [vmem:[%s1793_s29] sm:$0xff] (%p43_p3), %v168_v0  ;;  %171 = vst [vmem:[%s1793_s29 + $0x8] sm:$0xff] (%p43_p3), %v170_v1  ;;  %v174_v3 = vld [vmem:[%s1788_s28 + $0x18] sm:$0xff] (%p43_p3)  ;;  %v176_v4 = vld [vmem:[%s1788_s28 + $0x20] sm:$0xff] (%p43_p3) }
  0x17   : > { %173 = vst [vmem:[%s1793_s29 + $0x10] sm:$0xff] (%p43_p3), %v172_v2  ;;  %v178_v5 = vld [vmem:[%s1788_s28 + $0x28] sm:$0xff] (%p43_p3)  ;;  %175 = vst [vmem:[%s1793_s29 + $0x18] sm:$0xff] (%p43_p3), %v174_v3  ;;  %v180_v6 = vld [vmem:[%s1788_s28 + $0x30] sm:$0xff] (%p43_p3) }
  0x18   : > { %177 = vst [vmem:[%s1793_s29 + $0x20] sm:$0xff] (%p43_p3), %v176_v4  ;;  %179 = vst [vmem:[%s1793_s29 + $0x28] sm:$0xff] (%p43_p3), %v178_v5  ;;  %v182_v7 = vld [vmem:[%s1788_s28 + $0x38] sm:$0xff] (%p43_p3)  ;;  %v184_v8 = vld [vmem:[%s1788_s28 + $0x40] sm:$0xff] (%p43_p3) }
  0x19   : > { %181 = vst [vmem:[%s1793_s29 + $0x30] sm:$0xff] %v180_v6  ;;  %183 = vst [vmem:[%s1793_s29 + $0x38] sm:$0xff] %v182_v7  ;;  %v186_v9 = vld [vmem:[%s1788_s28 + $0x48] sm:$0xff]  ;;  %v188_v10 = vld [vmem:[%s1788_s28 + $0x50] sm:$0xff] }
  0x1a   : > { %185 = vst [vmem:[%s1793_s29 + $0x40] sm:$0xff] %v184_v8  ;;  %v190_v11 = vld [vmem:[%s1788_s28 + $0x58] sm:$0xff]  ;;  %187 = vst [vmem:[%s1793_s29 + $0x48] sm:$0xff] %v186_v9  ;;  %v192_v12 = vld [vmem:[%s1788_s28 + $0x60] sm:$0xff] }
  0x1b   : > { %189 = vst [vmem:[%s1793_s29 + $0x50] sm:$0xff] %v188_v10  ;;  %191 = vst [vmem:[%s1793_s29 + $0x58] sm:$0xff] %v190_v11  ;;  %v194_v13 = vld [vmem:[%s1788_s28 + $0x68] sm:$0xff]  ;;  %v196_v14 = vld [vmem:[%s1788_s28 + $0x70] sm:$0xff] }
  0x1c   : > { %193 = vst [vmem:[%s1793_s29 + $0x60] sm:$0xff] %v192_v12  ;;  %195 = vst [vmem:[%s1793_s29 + $0x68] sm:$0xff] %v194_v13  ;;  %v198_v15 = vld [vmem:[%s1788_s28 + $0x78] sm:$0xff]  ;;  %v200_v16 = vld [vmem:[%s1788_s28 + $0x100] sm:$0xff] }
  0x1d   : > { %197 = vst [vmem:[%s1793_s29 + $0x70] sm:$0xff] %v196_v14  ;;  %v202_v17 = vld [vmem:[%s1788_s28 + $0x108] sm:$0xff]  ;;  %199 = vst [vmem:[%s1793_s29 + $0x78] sm:$0xff] %v198_v15  ;;  %v204_v18 = vld [vmem:[%s1788_s28 + $0x110] sm:$0xff] }
  0x1e   : > { %201 = vst [vmem:[%s1793_s29 + $0x80] sm:$0xff] %v200_v16  ;;  %203 = vst [vmem:[%s1793_s29 + $0x88] sm:$0xff] %v202_v17  ;;  %v206_v19 = vld [vmem:[%s1788_s28 + $0x118] sm:$0xff]  ;;  %v208_v20 = vld [vmem:[%s1788_s28 + $0x120] sm:$0xff] }
  0x1f   : > { %205 = vst [vmem:[%s1793_s29 + $0x90] sm:$0xff] %v204_v18  ;;  %207 = vst [vmem:[%s1793_s29 + $0x98] sm:$0xff] %v206_v19  ;;  %v210_v21 = vld [vmem:[%s1788_s28 + $0x128] sm:$0xff]  ;;  %v212_v22 = vld [vmem:[%s1788_s28 + $0x130] sm:$0xff] }
  0x20   : > { %209 = vst [vmem:[%s1793_s29 + $0xa0] sm:$0xff] %v208_v20  ;;  %v214_v23 = vld [vmem:[%s1788_s28 + $0x138] sm:$0xff]  ;;  %211 = vst [vmem:[%s1793_s29 + $0xa8] sm:$0xff] %v210_v21  ;;  %v216_v24 = vld [vmem:[%s1788_s28 + $0x140] sm:$0xff] }
  0x21   : > { %213 = vst [vmem:[%s1793_s29 + $0xb0] sm:$0xff] %v212_v22  ;;  %215 = vst [vmem:[%s1793_s29 + $0xb8] sm:$0xff] %v214_v23  ;;  %v218_v25 = vld [vmem:[%s1788_s28 + $0x148] sm:$0xff]  ;;  %v220_v26 = vld [vmem:[%s1788_s28 + $0x150] sm:$0xff] }
  0x22   : > { %217 = vst [vmem:[%s1793_s29 + $0xc0] sm:$0xff] %v216_v24  ;;  %219 = vst [vmem:[%s1793_s29 + $0xc8] sm:$0xff] %v218_v25  ;;  %v222_v27 = vld [vmem:[%s1788_s28 + $0x158] sm:$0xff]  ;;  %v224_v28 = vld [vmem:[%s1788_s28 + $0x160] sm:$0xff] }
  0x23   : > { %221 = vst [vmem:[%s1793_s29 + $0xd0] sm:$0xff] %v220_v26  ;;  %v226_v29 = vld [vmem:[%s1788_s28 + $0x168] sm:$0xff]  ;;  %223 = vst [vmem:[%s1793_s29 + $0xd8] sm:$0xff] %v222_v27  ;;  %v228_v30 = vld [vmem:[%s1788_s28 + $0x170] sm:$0xff] }
  0x24   : > { %225 = vst [vmem:[%s1793_s29 + $0xe0] sm:$0xff] %v224_v28  ;;  %227 = vst [vmem:[%s1793_s29 + $0xe8] sm:$0xff] %v226_v29  ;;  %v230_v31 = vld [vmem:[%s1788_s28 + $0x178] sm:$0xff]  ;;  %v232_v32 = vld [vmem:[%s1788_s28 + $0x200] sm:$0xff] }
  0x25   : > { %229 = vst [vmem:[%s1793_s29 + $0xf0] sm:$0xff] %v228_v30  ;;  %231 = vst [vmem:[%s1793_s29 + $0xf8] sm:$0xff] %v230_v31  ;;  %v234_v33 = vld [vmem:[%s1788_s28 + $0x208] sm:$0xff]  ;;  %v236_v34 = vld [vmem:[%s1788_s28 + $0x210] sm:$0xff] }
  0x26   : > { %233 = vst [vmem:[%s1793_s29 + $0x100] sm:$0xff] %v232_v32  ;;  %v238_v35 = vld [vmem:[%s1788_s28 + $0x218] sm:$0xff]  ;;  %235 = vst [vmem:[%s1793_s29 + $0x108] sm:$0xff] %v234_v33  ;;  %v240_v36 = vld [vmem:[%s1788_s28 + $0x220] sm:$0xff] }
  0x27   : > { %237 = vst [vmem:[%s1793_s29 + $0x110] sm:$0xff] %v236_v34  ;;  %239 = vst [vmem:[%s1793_s29 + $0x118] sm:$0xff] %v238_v35  ;;  %v242_v37 = vld [vmem:[%s1788_s28 + $0x228] sm:$0xff]  ;;  %v244_v38 = vld [vmem:[%s1788_s28 + $0x230] sm:$0xff] }
  0x28   : > { %241 = vst [vmem:[%s1793_s29 + $0x120] sm:$0xff] %v240_v36  ;;  %243 = vst [vmem:[%s1793_s29 + $0x128] sm:$0xff] %v242_v37  ;;  %v246_v39 = vld [vmem:[%s1788_s28 + $0x238] sm:$0xff]  ;;  %v248_v40 = vld [vmem:[%s1788_s28 + $0x240] sm:$0xff] }
  0x29   : > { %245 = vst [vmem:[%s1793_s29 + $0x130] sm:$0xff] %v244_v38  ;;  %v250_v41 = vld [vmem:[%s1788_s28 + $0x248] sm:$0xff]  ;;  %247 = vst [vmem:[%s1793_s29 + $0x138] sm:$0xff] %v246_v39  ;;  %v252_v42 = vld [vmem:[%s1788_s28 + $0x250] sm:$0xff] }
  0x2a   : > { %249 = vst [vmem:[%s1793_s29 + $0x140] sm:$0xff] %v248_v40  ;;  %251 = vst [vmem:[%s1793_s29 + $0x148] sm:$0xff] %v250_v41  ;;  %v254_v43 = vld [vmem:[%s1788_s28 + $0x258] sm:$0xff]  ;;  %v256_v44 = vld [vmem:[%s1788_s28 + $0x260] sm:$0xff] }
  0x2b   : > { %253 = vst [vmem:[%s1793_s29 + $0x150] sm:$0xff] %v252_v42  ;;  %255 = vst [vmem:[%s1793_s29 + $0x158] sm:$0xff] %v254_v43  ;;  %v258_v45 = vld [vmem:[%s1788_s28 + $0x268] sm:$0xff]  ;;  %v260_v46 = vld [vmem:[%s1788_s28 + $0x270] sm:$0xff] }
  0x2c   : > { %257 = vst [vmem:[%s1793_s29 + $0x160] sm:$0xff] %v256_v44  ;;  %v262_v47 = vld [vmem:[%s1788_s28 + $0x278] sm:$0xff]  ;;  %259 = vst [vmem:[%s1793_s29 + $0x168] sm:$0xff] %v258_v45  ;;  %v264_v48 = vld [vmem:[%s1788_s28 + $0x300] sm:$0xff] }
  0x2d   : > { %261 = vst [vmem:[%s1793_s29 + $0x170] sm:$0xff] %v260_v46  ;;  %263 = vst [vmem:[%s1793_s29 + $0x178] sm:$0xff] %v262_v47  ;;  %v266_v49 = vld [vmem:[%s1788_s28 + $0x308] sm:$0xff]  ;;  %v268_v50 = vld [vmem:[%s1788_s28 + $0x310] sm:$0xff] }
  0x2e   : > { %265 = vst [vmem:[%s1793_s29 + $0x180] sm:$0xff] %v264_v48  ;;  %267 = vst [vmem:[%s1793_s29 + $0x188] sm:$0xff] %v266_v49  ;;  %v270_v51 = vld [vmem:[%s1788_s28 + $0x318] sm:$0xff]  ;;  %v272_v52 = vld [vmem:[%s1788_s28 + $0x320] sm:$0xff] }
  0x2f   : > { %269 = vst [vmem:[%s1793_s29 + $0x190] sm:$0xff] %v268_v50  ;;  %v274_v53 = vld [vmem:[%s1788_s28 + $0x328] sm:$0xff]  ;;  %271 = vst [vmem:[%s1793_s29 + $0x198] sm:$0xff] %v270_v51  ;;  %v276_v54 = vld [vmem:[%s1788_s28 + $0x330] sm:$0xff] }
  0x30   : > { %273 = vst [vmem:[%s1793_s29 + $0x1a0] sm:$0xff] %v272_v52  ;;  %275 = vst [vmem:[%s1793_s29 + $0x1a8] sm:$0xff] %v274_v53  ;;  %v278_v55 = vld [vmem:[%s1788_s28 + $0x338] sm:$0xff]  ;;  %v280_v56 = vld [vmem:[%s1788_s28 + $0x340] sm:$0xff] }
  0x31   : > { %277 = vst [vmem:[%s1793_s29 + $0x1b0] sm:$0xff] %v276_v54  ;;  %279 = vst [vmem:[%s1793_s29 + $0x1b8] sm:$0xff] %v278_v55  ;;  %v282_v57 = vld [vmem:[%s1788_s28 + $0x348] sm:$0xff]  ;;  %v284_v58 = vld [vmem:[%s1788_s28 + $0x350] sm:$0xff] }
  0x32   : > { %281 = vst [vmem:[%s1793_s29 + $0x1c0] sm:$0xff] %v280_v56  ;;  %v286_v59 = vld [vmem:[%s1788_s28 + $0x358] sm:$0xff]  ;;  %283 = vst [vmem:[%s1793_s29 + $0x1c8] sm:$0xff] %v282_v57  ;;  %v288_v60 = vld [vmem:[%s1788_s28 + $0x360] sm:$0xff] }
  0x33   : > { %285 = vst [vmem:[%s1793_s29 + $0x1d0] sm:$0xff] %v284_v58  ;;  %287 = vst [vmem:[%s1793_s29 + $0x1d8] sm:$0xff] %v286_v59  ;;  %v290_v61 = vld [vmem:[%s1788_s28 + $0x368] sm:$0xff]  ;;  %v292_v62 = vld [vmem:[%s1788_s28 + $0x370] sm:$0xff] }
  0x34   : > { %289 = vst [vmem:[%s1793_s29 + $0x1e0] sm:$0xff] %v288_v60  ;;  %291 = vst [vmem:[%s1793_s29 + $0x1e8] sm:$0xff] %v290_v61  ;;  %v294_v63 = vld [vmem:[%s1788_s28 + $0x378] sm:$0xff] }
  0x35   : > { %293 = vst [vmem:[%s1793_s29 + $0x1f0] sm:$0xff] %v292_v62  ;;  %295 = vst [vmem:[%s1793_s29 + $0x1f8] sm:$0xff] %v294_v63 }
  0x36 PF: > { %p1494_p8 = scmp.ge.s32.totalorder %s1715_s16, 1  ;;  %p300_p9 = scmp.lt.s32.totalorder %s1715_s16, 3 }
  0x38   : > { %p301_p10 = pnand %p1494_p8, %p300_p9 }
  0x39   : > { %s307_s30 = sand.u32 (!%p301_p10), 1, %s1699_s12   ;;  %vm436_vm0 = vcmask (!%p301_p10), 1045504   ;;  %v1717_v0 = vmov (!%p301_p10), 0.0   ;;  %vm1718_vm1 = vmmov (!%p301_p10), 1   ;;  %v1719_v2 = vmov (!%p301_p10), 0   ;;  %v399_v3 = vld [vmem:[%s2448_s2] sm:$0xff] (!%p301_p10) }
  0x3a   : > { %304 = sbr.rel (%p301_p10) target bundleno = 367 (0x16f), region = 51  ;;  %s1923_s4 = sshll.u32 (!%p301_p10), %s307_s30, 9  ;;  %549 = vmatprep.mubr.f32.mxu0 (!%p301_p10), %v1717_v0  ;;  %638 = vmatprep.mubr.f32.mxu1 (!%p301_p10), %v1717_v0  ;;  %vm1927_vm2 = vmpackc.low (!%p301_p10), %vm436_vm0, %vm1718_vm1  ;;  %v400_v7 = vld [vmem:[%s2448_s2 + $0x8] sm:$0xff] (!%p301_p10)  ;;  %v1965_v31 = vld [vmem:[%s2447_s1] sm:$0xff] (!%p301_p10)  ;;  %vm423_vm3 = vcmask (!%p301_p10), 244736  }
  0x3b   : > { %1675 = vset.pattern.permute.xlu0 (!%p301_p10), %v1719_v2  ;;  %1676 = vset.pattern.permute.xlu1 (!%p301_p10), %v1719_v2  ;;  %s1935_s7 = scalar_lea.vmem (!%p301_p10), [#allocation2], %s1923_s4  ;;  %v1994_v54 = vld [vmem:[%s2447_s1 + $0x8] sm:$0xff] (!%p301_p10)  ;;  %v2012_v61 = vld [vmem:[%s2447_s1 + $0x10] sm:$0xff] (!%p301_p10)  ;;  %v2027_v62 = vld [vmem:[%s2447_s1 + $0x18] sm:$0xff] (!%p301_p10)  ;;  %s2164_s29 = scalar_lea.vmem (!%p301_p10), [#allocation3], %s1923_s4 }
  0x3c   : > { %v336_v4 = vld [vmem:[%s1935_s7 + $0x8] sm:$0xff] (!%p301_p10)  ;;  %v338_v6 = vld [vmem:[%s1935_s7 + $0x18] sm:$0xff] (!%p301_p10)  ;;  %405 = vperm.xlu0 (!%p301_p10), %1675, %v399_v3   ;;  %v335_v10 = vld [vmem:[%s1935_s7] sm:$0xff] (!%p301_p10) }
  0x3d   : > { %v352_v5 = vld [vmem:[%s1935_s7 + $0x88] sm:$0xff] (!%p301_p10)  ;;  %v354_v9 = vld [vmem:[%s1935_s7 + $0x98] sm:$0xff] (!%p301_p10)  ;;  %v351_v11 = vld [vmem:[%s1935_s7 + $0x80] sm:$0xff] (!%p301_p10) }
  0x3e   : > { %v1552_v8 = vpack.c.bf16 (!%p301_p10), %v352_v5, %v336_v4  ;;  %v1562_v12 = vpack.c.bf16 (!%p301_p10), %v354_v9, %v338_v6  ;;  %v1554_v13 = vpack.c.bf16 (!%p301_p10), %v351_v11, %v335_v10  ;;  %v337_v14 = vld [vmem:[%s1935_s7 + $0x10] sm:$0xff] (!%p301_p10)  ;;  %v368_v16 = vld [vmem:[%s1935_s7 + $0x108] sm:$0xff] (!%p301_p10)  ;;  %v370_v19 = vld [vmem:[%s1935_s7 + $0x118] sm:$0xff] (!%p301_p10) }
  0x3f   : > { %v353_v15 = vld [vmem:[%s1935_s7 + $0x90] sm:$0xff] (!%p301_p10)  ;;  %v384_v18 = vld [vmem:[%s1935_s7 + $0x188] sm:$0x3f] (!%p301_p10)  ;;  %v386_v20 = vld [vmem:[%s1935_s7 + $0x198] sm:$0x3f] (!%p301_p10) }
  0x40   : > { %1553 = vmatprep.subr.bf16.mxu0 (!%p301_p10), %v1552_v8  ;;  %v1564_v17 = vpack.c.bf16 (!%p301_p10), %v353_v15, %v337_v14  ;;  %1563 = vmatprep.subr.bf16.mxu1 (!%p301_p10), %v1562_v12  ;;  %v1556_v21 = vpack.c.bf16 (!%p301_p10), %v384_v18, %v368_v16  ;;  %v1566_v22 = vpack.c.bf16 (!%p301_p10), %v386_v20, %v370_v19  ;;  %v367_v23 = vld [vmem:[%s1935_s7 + $0x100] sm:$0xff] (!%p301_p10)  ;;  %v369_v25 = vld [vmem:[%s1935_s7 + $0x110] sm:$0xff] (!%p301_p10)  ;;  %v340_v28 = vld [vmem:[%s1935_s7 + $0x28] sm:$0xff] (!%p301_p10) }
  0x41   : > { %1555 = vmatpush1.bf16.msra.mxu0 %v1554_v13  ;;  %v383_v24 = vld [vmem:[%s1935_s7 + $0x180] sm:$0x3f]  ;;  %v385_v27 = vld [vmem:[%s1935_s7 + $0x190] sm:$0x3f]  ;;  %v356_v29 = vld [vmem:[%s1935_s7 + $0xa8] sm:$0xff]  ;;  %410 = vperm.xlu0 %1675, %v400_v7   ;;  %s1551_s30 = sshll.u32 (%p1775_p6), %s1707_s14, 7 }
  0x42   : > { %1565 = vmatpush1.bf16.msra.mxu1 %v1564_v17  ;;  %v1559_v26 = vpack.c.bf16 %v383_v24, %v367_v23  ;;  %1558 = vmatprep.subr.msk.bf16.mxu0 %vm1927_vm2, %v1556_v21  ;;  %v1569_v30 = vpack.c.bf16 %v385_v27, %v369_v25  ;;  %v1572_v32 = vpack.c.bf16 %v356_v29, %v340_v28  ;;  %v342_v33 = vld [vmem:[%s1935_s7 + $0x38] sm:$0xff]  ;;  %v339_v35 = vld [vmem:[%s1935_s7 + $0x20] sm:$0xff]  ;;  %v341_v38 = vld [vmem:[%s1935_s7 + $0x30] sm:$0xff]  ;;  %s2304_s6 = scalar_lea.vmem (%p1775_p6), %s2449_s3, %s1551_s30 }
  0x43   : > { %1568 = vmatprep.subr.msk.bf16.mxu1 %vm1927_vm2, %v1566_v22  ;;  %v358_v34 = vld [vmem:[%s1935_s7 + $0xb8] sm:$0xff]  ;;  %v355_v37 = vld [vmem:[%s1935_s7 + $0xa0] sm:$0xff]  ;;  %v357_v39 = vld [vmem:[%s1935_s7 + $0xb0] sm:$0xff] }
  0x44   : > { %v1582_v36 = vpack.c.bf16 %v358_v34, %v342_v33  ;;  %v1574_v40 = vpack.c.bf16 %v355_v37, %v339_v35  ;;  %v372_v41 = vld [vmem:[%s1935_s7 + $0x128] sm:$0xff]  ;;  %v374_v43 = vld [vmem:[%s1935_s7 + $0x138] sm:$0xff]  ;;  %v1584_v44 = vpack.c.bf16 %v357_v39, %v341_v38  ;;  %v371_v47 = vld [vmem:[%s1935_s7 + $0x120] sm:$0xff] }
  0x45   : > { %1561 = vmatpush1.bf16.msk.msra.mxu0 %vm1927_vm2, %v1559_v26  ;;  %v388_v42 = vld [vmem:[%s1935_s7 + $0x1a8] sm:$0x3f]  ;;  %v390_v45 = vld [vmem:[%s1935_s7 + $0x1b8] sm:$0x3f]  ;;  %v387_v48 = vld [vmem:[%s1935_s7 + $0x1a0] sm:$0x3f] }
  0x46   : > { %1571 = vmatpush1.bf16.msk.msra.mxu1 %vm1927_vm2, %v1569_v30  ;;  %1573 = vmatprep.subr.bf16.mxu0 %v1572_v32  ;;  %v1576_v46 = vpack.c.bf16 %v388_v42, %v372_v41  ;;  %v373_v49 = vld [vmem:[%s1935_s7 + $0x130] sm:$0xff]  ;;  %v1586_v50 = vpack.c.bf16 %v390_v45, %v374_v43  ;;  %v344_v52 = vld [vmem:[%s1935_s7 + $0x48] sm:$0xff]  ;;  %v346_v55 = vld [vmem:[%s1935_s7 + $0x58] sm:$0xff]  ;;  %v1579_v57 = vpack.c.bf16 %v387_v48, %v371_v47 }
  0x47   : > { %1583 = vmatprep.subr.bf16.mxu1 %v1582_v36  ;;  %v389_v51 = vld [vmem:[%s1935_s7 + $0x1b0] sm:$0x3f]  ;;  %v360_v53 = vld [vmem:[%s1935_s7 + $0xc8] sm:$0xff]  ;;  %v362_v56 = vld [vmem:[%s1935_s7 + $0xd8] sm:$0xff] }
  0x48   : > { %1499 = vmatmul.mubr.msk.f32.vlgmr.msra.gmra.mrb[0].mxu0 %vm423_vm3, %v1965_v31  ;;  %v1589_v58 = vpack.c.bf16 %v389_v51, %v373_v49  ;;  %v1592_v59 = vpack.c.bf16 %v360_v53, %v344_v52  ;;  %v1602_v60 = vpack.c.bf16 %v362_v56, %v346_v55  ;;  %v343_v63 = vld [vmem:[%s1935_s7 + $0x40] sm:$0xff]  ;;  %v401_v3 = vld [vmem:[%s2448_s2 + $0x10] sm:$0xff]  ;;  %v376_v6 = vld [vmem:[%s1935_s7 + $0x148] sm:$0xff] }
  0x49   : > { %1505 = vmatmul.mubr.msk.f32.vlgmr.msra.gmra.mrb[0].mxu1 %vm423_vm3, %v1965_v31  ;;  %1575 = vmatpush1.bf16.msra.mxu0 %v1574_v40  ;;  %v359_v2 = vld [vmem:[%s1935_s7 + $0xc0] sm:$0xff]  ;;  %v345_v4 = vld [vmem:[%s1935_s7 + $0x50] sm:$0xff]  ;;  %v392_v7 = vld [vmem:[%s1935_s7 + $0x1c8] sm:$0x3f] }
  0x4a   : > { %1585 = vmatpush1.bf16.msra.mxu1 %v1584_v44  ;;  %555 = vmatprep.mubr.f32.mxu0 %v1717_v0  ;;  %v361_v5 = vld [vmem:[%s1935_s7 + $0xd0] sm:$0xff]  ;;  %v402_v8 = vld [vmem:[%s2448_s2 + $0x18] sm:$0xff]  ;;  %v1594_v9 = vpack.c.bf16 %v359_v2, %v343_v63  ;;  %v1596_v13 = vpack.c.bf16 %v392_v7, %v376_v6  ;;  %v375_v14 = vld [vmem:[%s1935_s7 + $0x140] sm:$0xff] }
  0x4b   : > { %644 = vmatprep.mubr.f32.mxu1 %v1717_v0  ;;  %1578 = vmatprep.subr.msk.bf16.mxu0 %vm1927_vm2, %v1576_v46  ;;  %v378_v10 = vld [vmem:[%s1935_s7 + $0x158] sm:$0xff]  ;;  %v1604_v12 = vpack.c.bf16 %v361_v5, %v345_v4  ;;  %v391_v15 = vld [vmem:[%s1935_s7 + $0x1c0] sm:$0x3f]  ;;  %v377_v16 = vld [vmem:[%s1935_s7 + $0x150] sm:$0xff] }
  0x4c   : > { %1500 = vmatmul.mubr.msk.f32.gmra.mrb[2].mxu0 %vm423_vm3, %v1994_v54  ;;  %1588 = vmatprep.subr.msk.bf16.mxu1 %vm1927_vm2, %v1586_v50  ;;  %v394_v11 = vld [vmem:[%s1935_s7 + $0x1d8] sm:$0x3f]  ;;  %v393_v18 = vld [vmem:[%s1935_s7 + $0x1d0] sm:$0x3f]  ;;  %v348_v19 = vld [vmem:[%s1935_s7 + $0x68] sm:$0xff]  ;;  %v1599_v23 = vpack.c.bf16 %v391_v15, %v375_v14 }
  0x4d   : > { %1506 = vmatmul.mubr.msk.f32.gmra.mrb[2].mxu1 %vm423_vm3, %v1994_v54  ;;  %561 = vmatprep.mubr.f32.mxu0 %v1717_v0  ;;  %v1606_v17 = vpack.c.bf16 %v394_v11, %v378_v10  ;;  %v364_v20 = vld [vmem:[%s1935_s7 + $0xe8] sm:$0xff]  ;;  %v350_v21 = vld [vmem:[%s1935_s7 + $0x78] sm:$0xff]  ;;  %v1609_v24 = vpack.c.bf16 %v393_v18, %v377_v16  ;;  %v347_v27 = vld [vmem:[%s1935_s7 + $0x60] sm:$0xff] }
  0x4e   : > { %650 = vmatprep.mubr.f32.mxu1 %v1717_v0  ;;  %1581 = vmatpush1.bf16.msk.msra.mxu0 %vm1927_vm2, %v1579_v57  ;;  %v366_v22 = vld [vmem:[%s1935_s7 + $0xf8] sm:$0xff]  ;;  %v1612_v25 = vpack.c.bf16 %v364_v20, %v348_v19  ;;  %v363_v28 = vld [vmem:[%s1935_s7 + $0xe0] sm:$0xff]  ;;  %v349_v29 = vld [vmem:[%s1935_s7 + $0x70] sm:$0xff] }
  0x4f   : > { %1591 = vmatpush1.bf16.msk.msra.mxu1 %vm1927_vm2, %v1589_v58  ;;  %1593 = vmatprep.subr.bf16.mxu0 %v1592_v59  ;;  %v1622_v26 = vpack.c.bf16 %v366_v22, %v350_v21  ;;  %v365_v30 = vld [vmem:[%s1935_s7 + $0xf0] sm:$0xff]  ;;  %v380_v32 = vld [vmem:[%s1935_s7 + $0x168] sm:$0xff]  ;;  %v1614_v34 = vpack.c.bf16 %v363_v28, %v347_v27  ;;  %v382_v35 = vld [vmem:[%s1935_s7 + $0x178] sm:$0xff] }
  0x50   : > { %1501 = vmatmul.mubr.msk.f32.gmra.mrb[4].mxu0 %vm423_vm3, %v2012_v61  ;;  %1603 = vmatprep.subr.bf16.mxu1 %v1602_v60  ;;  %v396_v33 = vld [vmem:[%s1935_s7 + $0x1e8] sm:$0x3f]  ;;  %v398_v36 = vld [vmem:[%s1935_s7 + $0x1f8] sm:$0x3f]  ;;  %v1624_v37 = vpack.c.bf16 %v365_v30, %v349_v29  ;;  %v379_v39 = vld [vmem:[%s1935_s7 + $0x160] sm:$0xff] }
  0x51   : > { %1507 = vmatmul.mubr.msk.f32.gmra.mrb[4].mxu1 %vm423_vm3, %v2012_v61  ;;  %567 = vmatprep.mubr.f32.mxu0 %v1717_v0  ;;  %v1616_v38 = vpack.c.bf16 %v396_v33, %v380_v32  ;;  %v395_v40 = vld [vmem:[%s1935_s7 + $0x1e0] sm:$0x3f]  ;;  %v1626_v41 = vpack.c.bf16 %v398_v36, %v382_v35  ;;  %v381_v42 = vld [vmem:[%s1935_s7 + $0x170] sm:$0xff] }
  0x52   : > { %656 = vmatprep.mubr.f32.mxu1 %v1717_v0  ;;  %415 = vperm.xlu1 %1676, %v401_v3   ;;  %v397_v43 = vld [vmem:[%s1935_s7 + $0x1f0] sm:$0x3f]  ;;  %v1619_v44 = vpack.c.bf16 %v395_v40, %v379_v39 }
  0x53   : > { %v1629_v45 = vpack.c.bf16 %v397_v43, %v381_v42 }
  0x54   : > { %1502 = vmatmul.mubr.msk.f32.gmra.mrb[6].mxu0 %vm423_vm3, %v2027_v62 }
  0x55   : > { %1508 = vmatmul.mubr.msk.f32.gmra.mrb[6].mxu1 %vm423_vm3, %v2027_v62  ;;  %727 = vmatprep.mubr.f32.mxu0 %v1717_v0 }
  0x56   : > { %816 = vmatprep.mubr.f32.mxu1 %v1717_v0  ;;  %420 = vperm.xlu1 %1676, %v402_v8  }
  0x58   : > { %1511 = vmatmul.mubr.msk.f32.vlgmr.msra.gmra.mrb[8].mxu0 %vm423_vm3, %v1965_v31 }
  0x59   : > { %1517 = vmatmul.mubr.msk.f32.vlgmr.msra.gmra.mrb[8].mxu1 %vm423_vm3, %v1965_v31  ;;  %1595 = vmatpush1.bf16.msra.mxu0 %v1594_v9 }
  0x5a   : > { %1605 = vmatpush1.bf16.msra.mxu1 %v1604_v12  ;;  %733 = vmatprep.mubr.f32.mxu0 %v1717_v0 }
  0x5b   : > { %822 = vmatprep.mubr.f32.mxu1 %v1717_v0  ;;  %1598 = vmatprep.subr.msk.bf16.mxu0 %vm1927_vm2, %v1596_v13 }
  0x5c   : > { %1512 = vmatmul.mubr.msk.f32.gmra.mrb[10].mxu0 %vm423_vm3, %v1994_v54  ;;  %1608 = vmatprep.subr.msk.bf16.mxu1 %vm1927_vm2, %v1606_v17 }
  0x5d   : > { %1518 = vmatmul.mubr.msk.f32.gmra.mrb[10].mxu1 %vm423_vm3, %v1994_v54  ;;  %739 = vmatprep.mubr.f32.mxu0 %v1717_v0 }
  0x5e   : > { %828 = vmatprep.mubr.f32.mxu1 %v1717_v0  ;;  %1601 = vmatpush1.bf16.msk.msra.mxu0 %vm1927_vm2, %v1599_v23 }
  0x5f   : > { %1611 = vmatpush1.bf16.msk.msra.mxu1 %vm1927_vm2, %v1609_v24  ;;  %1613 = vmatprep.subr.bf16.mxu0 %v1612_v25 }
  0x60   : > { %1513 = vmatmul.mubr.msk.f32.gmra.mrb[12].mxu0 %vm423_vm3, %v2012_v61  ;;  %1623 = vmatprep.subr.bf16.mxu1 %v1622_v26 }
  0x61   : > { %1519 = vmatmul.mubr.msk.f32.gmra.mrb[12].mxu1 %vm423_vm3, %v2012_v61  ;;  %745 = vmatprep.mubr.f32.mxu0 %v1717_v0 }
  0x62   : > { %834 = vmatprep.mubr.f32.mxu1 %v1717_v0 }
  0x64   : > { %1514 = vmatmul.mubr.msk.f32.gmra.mrb[14].mxu0 %vm423_vm3, %v2027_v62 }
  0x65   : > { %1520 = vmatmul.mubr.msk.f32.gmra.mrb[14].mxu1 %vm423_vm3, %v2027_v62  ;;  %905 = vmatprep.mubr.f32.mxu0 %v1717_v0 }
  0x66   : > { %994 = vmatprep.mubr.f32.mxu1 %v1717_v0 }
  0x68   : > { %1523 = vmatmul.mubr.msk.f32.vlgmr.msra.gmra.mrb[16].mxu0 %vm423_vm3, %v1965_v31 }
  0x69   : > { %1529 = vmatmul.mubr.msk.f32.vlgmr.msra.gmra.mrb[16].mxu1 %vm423_vm3, %v1965_v31  ;;  %1615 = vmatpush1.bf16.msra.mxu0 %v1614_v34 }
  0x6a   : > { %1625 = vmatpush1.bf16.msra.mxu1 %v1624_v37  ;;  %911 = vmatprep.mubr.f32.mxu0 %v1717_v0 }
  0x6b   : > { %1000 = vmatprep.mubr.f32.mxu1 %v1717_v0  ;;  %1618 = vmatprep.subr.msk.bf16.mxu0 %vm1927_vm2, %v1616_v38 }
  0x6c   : > { %1524 = vmatmul.mubr.msk.f32.gmra.mrb[18].mxu0 %vm423_vm3, %v1994_v54  ;;  %1628 = vmatprep.subr.msk.bf16.mxu1 %vm1927_vm2, %v1626_v41 }
  0x6d   : > { %1530 = vmatmul.mubr.msk.f32.gmra.mrb[18].mxu1 %vm423_vm3, %v1994_v54  ;;  %917 = vmatprep.mubr.f32.mxu0 %v1717_v0 }
  0x6e   : > { %1006 = vmatprep.mubr.f32.mxu1 %v1717_v0  ;;  %1621 = vmatpush1.bf16.msk.msra.mxu0 %vm1927_vm2, %v1619_v44 }
  0x6f   : > { %1631 = vmatpush1.bf16.msk.msra.mxu1 %vm1927_vm2, %v1629_v45 }
  0x70   : > { %1525 = vmatmul.mubr.msk.f32.gmra.mrb[20].mxu0 %vm423_vm3, %v2012_v61 }
  0x71   : > { %1531 = vmatmul.mubr.msk.f32.gmra.mrb[20].mxu1 %vm423_vm3, %v2012_v61  ;;  %923 = vmatprep.mubr.f32.mxu0 %v1717_v0 }
  0x72   : > { %1012 = vmatprep.mubr.f32.mxu1 %v1717_v0 }
  0x74   : > { %1526 = vmatmul.mubr.msk.f32.gmra.mrb[22].mxu0 %vm423_vm3, %v2027_v62 }
  0x75   : > { %1532 = vmatmul.mubr.msk.f32.gmra.mrb[22].mxu1 %vm423_vm3, %v2027_v62  ;;  %1083 = vmatprep.mubr.f32.mxu0 %v1717_v0 }
  0x76   : > { %1172 = vmatprep.mubr.f32.mxu1 %v1717_v0 }
  0x78   : > { %1535 = vmatmul.mubr.msk.f32.vlgmr.msra.gmra.mrb[24].mxu0 %vm423_vm3, %v1965_v31 }
  0x79   : > { %1541 = vmatmul.mubr.msk.f32.vlgmr.msra.gmra.mrb[24].mxu1 %vm423_vm3, %v1965_v31  ;;  %1089 = vmatprep.mubr.f32.mxu0 %v1717_v0 }
  0x7a   : > { %1178 = vmatprep.mubr.f32.mxu1 %v1717_v0 }
  0x7c   : > { %1536 = vmatmul.mubr.msk.f32.gmra.mrb[26].mxu0 %vm423_vm3, %v1994_v54 }
  0x7d   : > { %1542 = vmatmul.mubr.msk.f32.gmra.mrb[26].mxu1 %vm423_vm3, %v1994_v54  ;;  %1095 = vmatprep.mubr.f32.mxu0 %v1717_v0 }
  0x7e   : > { %1184 = vmatprep.mubr.f32.mxu1 %v1717_v0 }
  0x80   : > { %1537 = vmatmul.mubr.msk.f32.gmra.mrb[28].mxu0 %vm423_vm3, %v2012_v61 }
  0x81   : > { %1543 = vmatmul.mubr.msk.f32.gmra.mrb[28].mxu1 %vm423_vm3, %v2012_v61  ;;  %1101 = vmatprep.mubr.f32.mxu0 %v1717_v0 }
  0x82   : > { %1190 = vmatprep.mubr.f32.mxu1 %v1717_v0 }
  0x84   : > { %1538 = vmatmul.mubr.msk.f32.gmra.mrb[30].mxu0 %vm423_vm3, %v2027_v62 }
  0x85   : > { %1544 = vmatmul.mubr.msk.f32.gmra.mrb[30].mxu1 %vm423_vm3, %v2027_v62 }
  0xbb   : > { %v2156_v1 = vpop.permute.xlu0 %405 }
  0xc0   : > { %v2161_v52 = vpop.permute.xlu0 %410 }
  0xd1   : > { %v2170_v54 = vpop.permute.xlu1 %415 }
  0xd5   : > { %v2184_v7 = vpop.permute.xlu1 %420 }
 0x11b   : > { %v551_v31 = vpop.f32.mrb[0].mxu0 }
 0x11c   : > { %v640_v46 = vpop.f32.mrb[0].mxu1  ;;  %v552_v47 = vadd.f32 %v551_v31, %v2156_v1  ;;  %v553_v48 = vpop.f32.mrb[1].mxu0 }
 0x11d   : > { %v641_v49 = vadd.f32 %v640_v46, %v2156_v1  ;;  %v554_v50 = vadd.f32 %v553_v48, %v2156_v1  ;;  %v642_v51 = vpop.f32.mrb[1].mxu1 }
 0x11e   : > { %1197 = vst [vmem:[%s2164_s29] sm:$0xff] %v552_v47  ;;  %v643_v0 = vadd.f32 %v642_v51, %v2156_v1 }
 0x11f   : > { %1199 = vst [vmem:[%s2164_s29 + $0x10] sm:$0xff] %v641_v49  ;;  %1198 = vst [vmem:[%s2164_s29 + $0x8] sm:$0xff] %v554_v50  ;;  %v557_v53 = vpop.f32.mrb[2].mxu0 }
 0x120   : > { %1200 = vst [vmem:[%s2164_s29 + $0x18] sm:$0xff] %v643_v0  ;;  %v646_v55 = vpop.f32.mrb[2].mxu1  ;;  %v558_v56 = vadd.f32 %v557_v53, %v2161_v52  ;;  %v559_v57 = vpop.f32.mrb[3].mxu0 }
 0x121   : > { %v647_v58 = vadd.f32 %v646_v55, %v2161_v52  ;;  %v560_v59 = vadd.f32 %v559_v57, %v2161_v52  ;;  %v648_v60 = vpop.f32.mrb[3].mxu1 }
 0x122   : > { %1213 = vst [vmem:[%s2164_s29 + $0x80] sm:$0xff] %v558_v56  ;;  %v649_v61 = vadd.f32 %v648_v60, %v2161_v52 }
 0x123   : > { %1215 = vst [vmem:[%s2164_s29 + $0x90] sm:$0xff] %v647_v58  ;;  %1214 = vst [vmem:[%s2164_s29 + $0x88] sm:$0xff] %v560_v59  ;;  %v563_v62 = vpop.f32.mrb[4].mxu0 }
 0x124   : > { %1216 = vst [vmem:[%s2164_s29 + $0x98] sm:$0xff] %v649_v61  ;;  %v652_v63 = vpop.f32.mrb[4].mxu1  ;;  %v564_v2 = vadd.f32 %v563_v62, %v2170_v54  ;;  %v565_v3 = vpop.f32.mrb[5].mxu0 }
 0x125   : > { %v653_v4 = vadd.f32 %v652_v63, %v2170_v54  ;;  %v566_v5 = vadd.f32 %v565_v3, %v2170_v54  ;;  %v654_v6 = vpop.f32.mrb[5].mxu1 }
 0x126   : > { %1229 = vst [vmem:[%s2164_s29 + $0x100] sm:$0xff] %v564_v2  ;;  %v655_v8 = vadd.f32 %v654_v6, %v2170_v54 }
 0x127   : > { %1231 = vst [vmem:[%s2164_s29 + $0x110] sm:$0xff] %v653_v4  ;;  %1230 = vst [vmem:[%s2164_s29 + $0x108] sm:$0xff] %v566_v5  ;;  %v569_v9 = vpop.f32.mrb[6].mxu0 }
 0x128   : > { %1232 = vst [vmem:[%s2164_s29 + $0x118] sm:$0xff] %v655_v8  ;;  %v658_v10 = vpop.f32.mrb[6].mxu1  ;;  %v570_v11 = vadd.f32 %v569_v9, %v2184_v7  ;;  %v571_v12 = vpop.f32.mrb[7].mxu0 }
 0x129   : > { %v659_v13 = vadd.f32 %v658_v10, %v2184_v7  ;;  %v572_v14 = vadd.f32 %v571_v12, %v2184_v7  ;;  %v660_v15 = vpop.f32.mrb[7].mxu1 }
 0x12a   : > { %1245 = vst [vmem:[%s2164_s29 + $0x180] sm:$0xff] %v570_v11  ;;  %v661_v16 = vadd.f32 %v660_v15, %v2184_v7 }
 0x12b   : > { %1247 = vst [vmem:[%s2164_s29 + $0x190] sm:$0xff] %v659_v13  ;;  %1246 = vst [vmem:[%s2164_s29 + $0x188] sm:$0xff] %v572_v14  ;;  %v729_v17 = vpop.f32.mrb[8].mxu0 }
 0x12c   : > { %1248 = vst [vmem:[%s2164_s29 + $0x198] sm:$0xff] %v661_v16  ;;  %v730_v18 = vadd.f32 %v729_v17, %v2156_v1  ;;  %v818_v19 = vpop.f32.mrb[8].mxu1  ;;  %v731_v20 = vpop.f32.mrb[9].mxu0 }
 0x12d   : > { %v819_v21 = vadd.f32 %v818_v19, %v2156_v1  ;;  %v732_v22 = vadd.f32 %v731_v20, %v2156_v1  ;;  %v820_v23 = vpop.f32.mrb[9].mxu1 }
 0x12e   : > { %1201 = vst [vmem:[%s2164_s29 + $0x20] sm:$0xff] %v730_v18  ;;  %v821_v24 = vadd.f32 %v820_v23, %v2156_v1 }
 0x12f   : > { %1203 = vst [vmem:[%s2164_s29 + $0x30] sm:$0xff] %v819_v21  ;;  %1202 = vst [vmem:[%s2164_s29 + $0x28] sm:$0xff] %v732_v22  ;;  %v735_v25 = vpop.f32.mrb[10].mxu0 }
 0x130   : > { %1204 = vst [vmem:[%s2164_s29 + $0x38] sm:$0xff] %v821_v24  ;;  %v736_v26 = vadd.f32 %v735_v25, %v2161_v52  ;;  %v824_v27 = vpop.f32.mrb[10].mxu1  ;;  %v737_v28 = vpop.f32.mrb[11].mxu0 }
 0x131   : > { %v825_v29 = vadd.f32 %v824_v27, %v2161_v52  ;;  %v738_v30 = vadd.f32 %v737_v28, %v2161_v52  ;;  %v826_v32 = vpop.f32.mrb[11].mxu1 }
 0x132   : > { %1217 = vst [vmem:[%s2164_s29 + $0xa0] sm:$0xff] %v736_v26  ;;  %v827_v33 = vadd.f32 %v826_v32, %v2161_v52 }
 0x133   : > { %1219 = vst [vmem:[%s2164_s29 + $0xb0] sm:$0xff] %v825_v29  ;;  %1218 = vst [vmem:[%s2164_s29 + $0xa8] sm:$0xff] %v738_v30  ;;  %v741_v34 = vpop.f32.mrb[12].mxu0 }
 0x134   : > { %1220 = vst [vmem:[%s2164_s29 + $0xb8] sm:$0xff] %v827_v33  ;;  %v742_v35 = vadd.f32 %v741_v34, %v2170_v54  ;;  %v830_v36 = vpop.f32.mrb[12].mxu1  ;;  %v743_v37 = vpop.f32.mrb[13].mxu0 }
 0x135   : > { %v831_v38 = vadd.f32 %v830_v36, %v2170_v54  ;;  %v744_v39 = vadd.f32 %v743_v37, %v2170_v54  ;;  %v832_v40 = vpop.f32.mrb[13].mxu1 }
 0x136   : > { %1233 = vst [vmem:[%s2164_s29 + $0x120] sm:$0xff] %v742_v35  ;;  %v833_v41 = vadd.f32 %v832_v40, %v2170_v54 }
 0x137   : > { %1235 = vst [vmem:[%s2164_s29 + $0x130] sm:$0xff] %v831_v38  ;;  %1234 = vst [vmem:[%s2164_s29 + $0x128] sm:$0xff] %v744_v39  ;;  %v747_v42 = vpop.f32.mrb[14].mxu0 }
 0x138   : > { %1236 = vst [vmem:[%s2164_s29 + $0x138] sm:$0xff] %v833_v41  ;;  %v748_v43 = vadd.f32 %v747_v42, %v2184_v7  ;;  %v836_v44 = vpop.f32.mrb[14].mxu1  ;;  %v749_v45 = vpop.f32.mrb[15].mxu0 }
 0x139   : > { %v837_v31 = vadd.f32 %v836_v44, %v2184_v7  ;;  %v750_v46 = vadd.f32 %v749_v45, %v2184_v7  ;;  %v838_v47 = vpop.f32.mrb[15].mxu1 }
 0x13a   : > { %1249 = vst [vmem:[%s2164_s29 + $0x1a0] sm:$0xff] %v748_v43  ;;  %v839_v48 = vadd.f32 %v838_v47, %v2184_v7 }
 0x13b   : > { %1251 = vst [vmem:[%s2164_s29 + $0x1b0] sm:$0xff] %v837_v31  ;;  %1250 = vst [vmem:[%s2164_s29 + $0x1a8] sm:$0xff] %v750_v46  ;;  %v907_v49 = vpop.f32.mrb[16].mxu0 }
 0x13c   : > { %1252 = vst [vmem:[%s2164_s29 + $0x1b8] sm:$0xff] %v839_v48  ;;  %v908_v50 = vadd.f32 %v907_v49, %v2156_v1  ;;  %v996_v51 = vpop.f32.mrb[16].mxu1  ;;  %v909_v0 = vpop.f32.mrb[17].mxu0 }
 0x13d   : > { %v997_v53 = vadd.f32 %v996_v51, %v2156_v1  ;;  %v910_v55 = vadd.f32 %v909_v0, %v2156_v1  ;;  %v998_v56 = vpop.f32.mrb[17].mxu1  ;;  %v1287_v51 = vld [vmem:[%s2164_s29 + $0x8] sm:$0xff] (%p1775_p6)  ;;  %v1291_v0 = vld [vmem:[%s2164_s29 + $0x18] sm:$0xff] (%p1775_p6) }
 0x13e   : > { %1205 = vst [vmem:[%s2164_s29 + $0x40] sm:$0xff] %v908_v50  ;;  %v999_v57 = vadd.f32 %v998_v56, %v2156_v1  ;;  %1288 = vst [vmem:[%s2304_s6 + $0x8] sm:$0xff] (%p1775_p6), %v1287_v51  ;;  %v1297_v56 = vld [vmem:[%s2164_s29 + $0x30] sm:$0xff] (%p1775_p6) }
 0x13f   : > { %1207 = vst [vmem:[%s2164_s29 + $0x50] sm:$0xff] %v997_v53  ;;  %1206 = vst [vmem:[%s2164_s29 + $0x48] sm:$0xff] %v910_v55  ;;  %v913_v58 = vpop.f32.mrb[18].mxu0  ;;  %v1293_v53 = vld [vmem:[%s2164_s29 + $0x20] sm:$0xff] (%p1775_p6)  ;;  %v1295_v55 = vld [vmem:[%s2164_s29 + $0x28] sm:$0xff] (%p1775_p6) }
 0x140   : > { %1208 = vst [vmem:[%s2164_s29 + $0x58] sm:$0xff] %v999_v57  ;;  %v914_v59 = vadd.f32 %v913_v58, %v2161_v52  ;;  %v1002_v60 = vpop.f32.mrb[18].mxu1  ;;  %v915_v61 = vpop.f32.mrb[19].mxu0  ;;  %1292 = vst [vmem:[%s2304_s6 + $0x18] sm:$0xff] (%p1775_p6), %v1291_v0  ;;  %v1299_v57 = vld [vmem:[%s2164_s29 + $0x38] sm:$0xff] (%p1775_p6) }
 0x141   : > { %v1003_v62 = vadd.f32 %v1002_v60, %v2161_v52  ;;  %v916_v63 = vadd.f32 %v915_v61, %v2161_v52  ;;  %v1004_v2 = vpop.f32.mrb[19].mxu1  ;;  %1294 = vst [vmem:[%s2304_s6 + $0x20] sm:$0xff] (%p1775_p6), %v1293_v53  ;;  %1296 = vst [vmem:[%s2304_s6 + $0x28] sm:$0xff] (%p1775_p6), %v1295_v55 }
 0x142   : > { %1221 = vst [vmem:[%s2164_s29 + $0xc0] sm:$0xff] %v914_v59  ;;  %v1005_v3 = vadd.f32 %v1004_v2, %v2161_v52  ;;  %1298 = vst [vmem:[%s2304_s6 + $0x30] sm:$0xff] (%p1775_p6), %v1297_v56 }
 0x143   : > { %1223 = vst [vmem:[%s2164_s29 + $0xd0] sm:$0xff] %v1003_v62  ;;  %1222 = vst [vmem:[%s2164_s29 + $0xc8] sm:$0xff] %v916_v63  ;;  %v919_v4 = vpop.f32.mrb[20].mxu0 }
 0x144   : > { %1224 = vst [vmem:[%s2164_s29 + $0xd8] sm:$0xff] %v1005_v3  ;;  %v920_v5 = vadd.f32 %v919_v4, %v2170_v54  ;;  %v1008_v6 = vpop.f32.mrb[20].mxu1  ;;  %v921_v8 = vpop.f32.mrb[21].mxu0  ;;  %1300 = vst [vmem:[%s2304_s6 + $0x38] sm:$0xff] (%p1775_p6), %v1299_v57  ;;  %v1317_v4 = vld [vmem:[%s2164_s29 + $0x80] sm:$0xff] (%p1775_p6) }
 0x145   : > { %v1009_v9 = vadd.f32 %v1008_v6, %v2170_v54  ;;  %v922_v10 = vadd.f32 %v921_v8, %v2170_v54  ;;  %v1010_v11 = vpop.f32.mrb[21].mxu1  ;;  %v1301_v58 = vld [vmem:[%s2164_s29 + $0x40] sm:$0xff] (%p1775_p6)  ;;  %1318 = vst [vmem:[%s2304_s6 + $0x100] sm:$0xff] (%p1775_p6), %v1317_v4  ;;  %v1321_v6 = vld [vmem:[%s2164_s29 + $0x90] sm:$0xff] (%p1775_p6)  ;;  %v1323_v8 = vld [vmem:[%s2164_s29 + $0x98] sm:$0xff] (%p1775_p6) }
 0x146   : > { %1237 = vst [vmem:[%s2164_s29 + $0x140] sm:$0xff] %v920_v5  ;;  %v1011_v12 = vadd.f32 %v1010_v11, %v2170_v54  ;;  %1302 = vst [vmem:[%s2304_s6 + $0x40] sm:$0xff] (%p1775_p6), %v1301_v58  ;;  %v1303_v59 = vld [vmem:[%s2164_s29 + $0x48] sm:$0xff] (%p1775_p6)  ;;  %v1305_v60 = vld [vmem:[%s2164_s29 + $0x50] sm:$0xff] (%p1775_p6) }
 0x147   : > { %1239 = vst [vmem:[%s2164_s29 + $0x150] sm:$0xff] %v1009_v9  ;;  %1238 = vst [vmem:[%s2164_s29 + $0x148] sm:$0xff] %v922_v10  ;;  %v925_v13 = vpop.f32.mrb[22].mxu0  ;;  %v1307_v61 = vld [vmem:[%s2164_s29 + $0x58] sm:$0xff] (%p1775_p6)  ;;  %v1319_v5 = vld [vmem:[%s2164_s29 + $0x88] sm:$0xff] (%p1775_p6) }
 0x148   : > { %1240 = vst [vmem:[%s2164_s29 + $0x158] sm:$0xff] %v1011_v12  ;;  %v926_v14 = vadd.f32 %v925_v13, %v2184_v7  ;;  %v1014_v15 = vpop.f32.mrb[22].mxu1  ;;  %v927_v16 = vpop.f32.mrb[23].mxu0  ;;  %1304 = vst [vmem:[%s2304_s6 + $0x48] sm:$0xff] (%p1775_p6), %v1303_v59  ;;  %v1325_v9 = vld [vmem:[%s2164_s29 + $0xa0] sm:$0xff] (%p1775_p6)  ;;  %v1327_v10 = vld [vmem:[%s2164_s29 + $0xa8] sm:$0xff] (%p1775_p6) }
 0x149   : > { %v1015_v17 = vadd.f32 %v1014_v15, %v2184_v7  ;;  %v928_v18 = vadd.f32 %v927_v16, %v2184_v7  ;;  %v1016_v19 = vpop.f32.mrb[23].mxu1  ;;  %1306 = vst [vmem:[%s2304_s6 + $0x50] sm:$0xff] (%p1775_p6), %v1305_v60  ;;  %1308 = vst [vmem:[%s2304_s6 + $0x58] sm:$0xff] (%p1775_p6), %v1307_v61  ;;  %v1329_v11 = vld [vmem:[%s2164_s29 + $0xb0] sm:$0xff] (%p1775_p6)  ;;  %v1331_v12 = vld [vmem:[%s2164_s29 + $0xb8] sm:$0xff] (%p1775_p6) }
 0x14a   : > { %1253 = vst [vmem:[%s2164_s29 + $0x1c0] sm:$0xff] %v926_v14  ;;  %v1017_v20 = vadd.f32 %v1016_v19, %v2184_v7  ;;  %1320 = vst [vmem:[%s2304_s6 + $0x108] sm:$0xff] (%p1775_p6), %v1319_v5  ;;  %v1333_v13 = vld [vmem:[%s2164_s29 + $0xc0] sm:$0xff] (%p1775_p6)  ;;  %v1335_v14 = vld [vmem:[%s2164_s29 + $0xc8] sm:$0xff] (%p1775_p6) }
 0x14b   : > { %1255 = vst [vmem:[%s2164_s29 + $0x1d0] sm:$0xff] %v1015_v17  ;;  %1254 = vst [vmem:[%s2164_s29 + $0x1c8] sm:$0xff] %v928_v18  ;;  %v1085_v21 = vpop.f32.mrb[24].mxu0  ;;  %v1337_v15 = vld [vmem:[%s2164_s29 + $0xd0] sm:$0xff] (%p1775_p6)  ;;  %v1339_v16 = vld [vmem:[%s2164_s29 + $0xd8] sm:$0xff] (%p1775_p6) }
 0x14c   : > { %1256 = vst [vmem:[%s2164_s29 + $0x1d8] sm:$0xff] %v1017_v20  ;;  %v1086_v22 = vadd.f32 %v1085_v21, %v2156_v1  ;;  %v1174_v23 = vpop.f32.mrb[24].mxu1  ;;  %v1087_v24 = vpop.f32.mrb[25].mxu0  ;;  %1322 = vst [vmem:[%s2304_s6 + $0x110] sm:$0xff] (%p1775_p6), %v1321_v6  ;;  %v1349_v21 = vld [vmem:[%s2164_s29 + $0x100] sm:$0xff] (%p1775_p6) }
 0x14d   : > { %v1175_v25 = vadd.f32 %v1174_v23, %v2156_v1  ;;  %v1088_v26 = vadd.f32 %v1087_v24, %v2156_v1  ;;  %v1176_v27 = vpop.f32.mrb[25].mxu1  ;;  %1324 = vst [vmem:[%s2304_s6 + $0x118] sm:$0xff] (%p1775_p6), %v1323_v8  ;;  %1326 = vst [vmem:[%s2304_s6 + $0x120] sm:$0xff] (%p1775_p6), %v1325_v9  ;;  %v1353_v23 = vld [vmem:[%s2164_s29 + $0x110] sm:$0xff] (%p1775_p6)  ;;  %v1355_v24 = vld [vmem:[%s2164_s29 + $0x118] sm:$0xff] (%p1775_p6) }
 0x14e   : > { %1209 = vst [vmem:[%s2164_s29 + $0x60] sm:$0xff] %v1086_v22  ;;  %v1177_v28 = vadd.f32 %v1176_v27, %v2156_v1  ;;  %1328 = vst [vmem:[%s2304_s6 + $0x128] sm:$0xff] (%p1775_p6), %v1327_v10  ;;  %v1351_v22 = vld [vmem:[%s2164_s29 + $0x108] sm:$0xff] (%p1775_p6)  ;;  %v1361_v27 = vld [vmem:[%s2164_s29 + $0x130] sm:$0xff] (%p1775_p6) }
 0x14f   : > { %1211 = vst [vmem:[%s2164_s29 + $0x70] sm:$0xff] %v1175_v25  ;;  %1210 = vst [vmem:[%s2164_s29 + $0x68] sm:$0xff] %v1088_v26  ;;  %v1091_v29 = vpop.f32.mrb[26].mxu0  ;;  %v1357_v25 = vld [vmem:[%s2164_s29 + $0x120] sm:$0xff] (%p1775_p6)  ;;  %v1359_v26 = vld [vmem:[%s2164_s29 + $0x128] sm:$0xff] (%p1775_p6) }
 0x150   : > { %1212 = vst [vmem:[%s2164_s29 + $0x78] sm:$0xff] %v1177_v28  ;;  %v1092_v30 = vadd.f32 %v1091_v29, %v2161_v52  ;;  %v1180_v32 = vpop.f32.mrb[26].mxu1  ;;  %v1093_v33 = vpop.f32.mrb[27].mxu0  ;;  %1330 = vst [vmem:[%s2304_s6 + $0x130] sm:$0xff] (%p1775_p6), %v1329_v11  ;;  %v1363_v28 = vld [vmem:[%s2164_s29 + $0x138] sm:$0xff] (%p1775_p6)  ;;  %v1365_v29 = vld [vmem:[%s2164_s29 + $0x140] sm:$0xff] (%p1775_p6) }
 0x151   : > { %v1181_v34 = vadd.f32 %v1180_v32, %v2161_v52  ;;  %v1094_v35 = vadd.f32 %v1093_v33, %v2161_v52  ;;  %v1182_v36 = vpop.f32.mrb[27].mxu1  ;;  %1332 = vst [vmem:[%s2304_s6 + $0x138] sm:$0xff] (%p1775_p6), %v1331_v12  ;;  %1334 = vst [vmem:[%s2304_s6 + $0x140] sm:$0xff] (%p1775_p6), %v1333_v13  ;;  %v1369_v32 = vld [vmem:[%s2164_s29 + $0x150] sm:$0xff] (%p1775_p6)  ;;  %v1371_v33 = vld [vmem:[%s2164_s29 + $0x158] sm:$0xff] (%p1775_p6) }
 0x152   : > { %1225 = vst [vmem:[%s2164_s29 + $0xe0] sm:$0xff] %v1092_v30  ;;  %v1183_v1 = vadd.f32 %v1182_v36, %v2161_v52  ;;  %1336 = vst [vmem:[%s2304_s6 + $0x148] sm:$0xff] (%p1775_p6), %v1335_v14  ;;  %v1367_v30 = vld [vmem:[%s2164_s29 + $0x148] sm:$0xff] (%p1775_p6) }
 0x153   : > { %1227 = vst [vmem:[%s2164_s29 + $0xf0] sm:$0xff] %v1181_v34  ;;  %1226 = vst [vmem:[%s2164_s29 + $0xe8] sm:$0xff] %v1094_v35  ;;  %v1097_v37 = vpop.f32.mrb[28].mxu0 }
 0x154   : > { %1228 = vst [vmem:[%s2164_s29 + $0xf8] sm:$0xff] %v1183_v1  ;;  %v1098_v38 = vadd.f32 %v1097_v37, %v2170_v54  ;;  %v1186_v39 = vpop.f32.mrb[28].mxu1  ;;  %v1099_v40 = vpop.f32.mrb[29].mxu0  ;;  %1338 = vst [vmem:[%s2304_s6 + $0x150] sm:$0xff] (%p1775_p6), %v1337_v15  ;;  %v1381_v37 = vld [vmem:[%s2164_s29 + $0x180] sm:$0xff] (%p1775_p6) }
 0x155   : > { %v1187_v41 = vadd.f32 %v1186_v39, %v2170_v54  ;;  %v1100_v42 = vadd.f32 %v1099_v40, %v2170_v54  ;;  %v1188_v43 = vpop.f32.mrb[29].mxu1  ;;  %v1309_v62 = vld [vmem:[%s2164_s29 + $0x60] sm:$0xff] (%p1775_p6)  ;;  %1340 = vst [vmem:[%s2304_s6 + $0x158] sm:$0xff] (%p1775_p6), %v1339_v16  ;;  %1350 = vst [vmem:[%s2304_s6 + $0x200] sm:$0xff] (%p1775_p6), %v1349_v21  ;;  %v1385_v39 = vld [vmem:[%s2164_s29 + $0x190] sm:$0xff] (%p1775_p6) }
 0x156   : > { %1241 = vst [vmem:[%s2164_s29 + $0x160] sm:$0xff] %v1098_v38  ;;  %v1189_v52 = vadd.f32 %v1188_v43, %v2170_v54  ;;  %1267 = sbr.rel (!%p1775_p6) target bundleno = 367 (0x16f), region = 59  ;;  %v1285_v54 = vld [vmem:[%s2164_s29] sm:$0xff] (%p1775_p6)  ;;  %v1311_v63 = vld [vmem:[%s2164_s29 + $0x68] sm:$0xff] (%p1775_p6)  ;;  %v1313_v2 = vld [vmem:[%s2164_s29 + $0x70] sm:$0xff] (%p1775_p6) }
 0x157   : > { %1243 = vst [vmem:[%s2164_s29 + $0x170] sm:$0xff] %v1187_v41  ;;  %1242 = vst [vmem:[%s2164_s29 + $0x168] sm:$0xff] %v1100_v42  ;;  %v1103_v44 = vpop.f32.mrb[30].mxu0  ;;  %v1315_v3 = vld [vmem:[%s2164_s29 + $0x78] sm:$0xff] (%p1775_p6)  ;;  %v1383_v38 = vld [vmem:[%s2164_s29 + $0x188] sm:$0xff] (%p1775_p6) }
 0x158   : > { %1244 = vst [vmem:[%s2164_s29 + $0x178] sm:$0xff] %v1189_v52  ;;  %v1104_v45 = vadd.f32 %v1103_v44, %v2184_v7  ;;  %v1192_v31 = vpop.f32.mrb[30].mxu1  ;;  %v1105_v46 = vpop.f32.mrb[31].mxu0  ;;  %1286 = vst [vmem:[%s2304_s6] sm:$0xff] (%p1775_p6), %v1285_v54  ;;  %v1387_v40 = vld [vmem:[%s2164_s29 + $0x198] sm:$0xff] (%p1775_p6)  ;;  %v1389_v41 = vld [vmem:[%s2164_s29 + $0x1a0] sm:$0xff] (%p1775_p6) }
 0x159   : > { %v1193_v47 = vadd.f32 %v1192_v31, %v2184_v7  ;;  %v1106_v48 = vadd.f32 %v1105_v46, %v2184_v7  ;;  %v1194_v49 = vpop.f32.mrb[31].mxu1  ;;  %1310 = vst [vmem:[%s2304_s6 + $0x60] sm:$0xff] (%p1775_p6), %v1309_v62  ;;  %1312 = vst [vmem:[%s2304_s6 + $0x68] sm:$0xff] (%p1775_p6), %v1311_v63  ;;  %v1341_v17 = vld [vmem:[%s2164_s29 + $0xe0] sm:$0xff] (%p1775_p6)  ;;  %v1391_v42 = vld [vmem:[%s2164_s29 + $0x1a8] sm:$0xff] (%p1775_p6) }
 0x15a   : > { %1257 = vst [vmem:[%s2164_s29 + $0x1e0] sm:$0xff] %v1104_v45  ;;  %v1195_v50 = vadd.f32 %v1194_v49, %v2184_v7  ;;  %v1289_v7 = vld [vmem:[%s2164_s29 + $0x10] sm:$0xff] (%p1775_p6)  ;;  %1314 = vst [vmem:[%s2304_s6 + $0x70] sm:$0xff] (%p1775_p6), %v1313_v2  ;;  %v1343_v18 = vld [vmem:[%s2164_s29 + $0xe8] sm:$0xff] (%p1775_p6) }
 0x15b   : > { %1259 = vst [vmem:[%s2164_s29 + $0x1f0] sm:$0xff] %v1193_v47  ;;  %1258 = vst [vmem:[%s2164_s29 + $0x1e8] sm:$0xff] %v1106_v48  ;;  %v1345_v19 = vld [vmem:[%s2164_s29 + $0xf0] sm:$0xff] (%p1775_p6)  ;;  %v1347_v20 = vld [vmem:[%s2164_s29 + $0xf8] sm:$0xff] (%p1775_p6) }
 0x15c   : > { %1260 = vst [vmem:[%s2164_s29 + $0x1f8] sm:$0xff] %v1195_v50  ;;  %1290 = vst [vmem:[%s2304_s6 + $0x10] sm:$0xff] (%p1775_p6), %v1289_v7  ;;  %v1393_v43 = vld [vmem:[%s2164_s29 + $0x1b0] sm:$0xff] (%p1775_p6)  ;;  %v1395_v52 = vld [vmem:[%s2164_s29 + $0x1b8] sm:$0xff] (%p1775_p6) }
 0x15d   : > { %1316 = vst [vmem:[%s2304_s6 + $0x78] sm:$0xff] %v1315_v3  ;;  %1342 = vst [vmem:[%s2304_s6 + $0x160] sm:$0xff] %v1341_v17  ;;  %v1373_v34 = vld [vmem:[%s2164_s29 + $0x160] sm:$0xff]  ;;  %v1399_v45 = vld [vmem:[%s2164_s29 + $0x1c8] sm:$0xff] }
 0x15e   : > { %1344 = vst [vmem:[%s2304_s6 + $0x168] sm:$0xff] %v1343_v18  ;;  %1346 = vst [vmem:[%s2304_s6 + $0x170] sm:$0xff] %v1345_v19  ;;  %v1375_v35 = vld [vmem:[%s2164_s29 + $0x168] sm:$0xff]  ;;  %v1377_v36 = vld [vmem:[%s2164_s29 + $0x170] sm:$0xff] }
 0x15f   : > { %1348 = vst [vmem:[%s2304_s6 + $0x178] sm:$0xff] %v1347_v20  ;;  %1352 = vst [vmem:[%s2304_s6 + $0x208] sm:$0xff] %v1351_v22  ;;  %v1379_v1 = vld [vmem:[%s2164_s29 + $0x178] sm:$0xff]  ;;  %v1397_v44 = vld [vmem:[%s2164_s29 + $0x1c0] sm:$0xff] }
 0x160   : > { %1354 = vst [vmem:[%s2304_s6 + $0x210] sm:$0xff] %v1353_v23  ;;  %1356 = vst [vmem:[%s2304_s6 + $0x218] sm:$0xff] %v1355_v24  ;;  %v1401_v31 = vld [vmem:[%s2164_s29 + $0x1d0] sm:$0xff]  ;;  %v1403_v46 = vld [vmem:[%s2164_s29 + $0x1d8] sm:$0xff] }
 0x161   : > { %1358 = vst [vmem:[%s2304_s6 + $0x220] sm:$0xff] %v1357_v25  ;;  %1360 = vst [vmem:[%s2304_s6 + $0x228] sm:$0xff] %v1359_v26  ;;  %v1405_v47 = vld [vmem:[%s2164_s29 + $0x1e0] sm:$0xff] }
 0x162   : > { %1362 = vst [vmem:[%s2304_s6 + $0x230] sm:$0xff] %v1361_v27  ;;  %1364 = vst [vmem:[%s2304_s6 + $0x238] sm:$0xff] %v1363_v28  ;;  %v1407_v48 = vld [vmem:[%s2164_s29 + $0x1e8] sm:$0xff]  ;;  %v1409_v49 = vld [vmem:[%s2164_s29 + $0x1f0] sm:$0xff] }
 0x163   : > { %1366 = vst [vmem:[%s2304_s6 + $0x240] sm:$0xff] %v1365_v29  ;;  %1368 = vst [vmem:[%s2304_s6 + $0x248] sm:$0xff] %v1367_v30  ;;  %v1411_v50 = vld [vmem:[%s2164_s29 + $0x1f8] sm:$0xff] }
 0x164   : > { %1370 = vst [vmem:[%s2304_s6 + $0x250] sm:$0xff] %v1369_v32  ;;  %1372 = vst [vmem:[%s2304_s6 + $0x258] sm:$0xff] %v1371_v33 }
 0x165   : > { %1374 = vst [vmem:[%s2304_s6 + $0x260] sm:$0xff] %v1373_v34  ;;  %1376 = vst [vmem:[%s2304_s6 + $0x268] sm:$0xff] %v1375_v35 }
 0x166   : > { %1378 = vst [vmem:[%s2304_s6 + $0x270] sm:$0xff] %v1377_v36  ;;  %1380 = vst [vmem:[%s2304_s6 + $0x278] sm:$0xff] %v1379_v1 }
 0x167   : > { %1382 = vst [vmem:[%s2304_s6 + $0x300] sm:$0xff] %v1381_v37  ;;  %1384 = vst [vmem:[%s2304_s6 + $0x308] sm:$0xff] %v1383_v38 }
 0x168   : > { %1386 = vst [vmem:[%s2304_s6 + $0x310] sm:$0xff] %v1385_v39  ;;  %1388 = vst [vmem:[%s2304_s6 + $0x318] sm:$0xff] %v1387_v40 }
 0x169   : > { %1390 = vst [vmem:[%s2304_s6 + $0x320] sm:$0xff] %v1389_v41  ;;  %1392 = vst [vmem:[%s2304_s6 + $0x328] sm:$0xff] %v1391_v42 }
 0x16a   : > { %1394 = vst [vmem:[%s2304_s6 + $0x330] sm:$0xff] %v1393_v43  ;;  %1396 = vst [vmem:[%s2304_s6 + $0x338] sm:$0xff] %v1395_v52 }
 0x16b   : > { %1398 = vst [vmem:[%s2304_s6 + $0x340] sm:$0xff] %v1397_v44  ;;  %1400 = vst [vmem:[%s2304_s6 + $0x348] sm:$0xff] %v1399_v45 }
 0x16c   : > { %1402 = vst [vmem:[%s2304_s6 + $0x350] sm:$0xff] %v1401_v31  ;;  %1404 = vst [vmem:[%s2304_s6 + $0x358] sm:$0xff] %v1403_v46 }
 0x16d   : > { %1406 = vst [vmem:[%s2304_s6 + $0x360] sm:$0xff] %v1405_v47  ;;  %1408 = vst [vmem:[%s2304_s6 + $0x368] sm:$0xff] %v1407_v48 }
 0x16e   : > { %1410 = vst [vmem:[%s2304_s6 + $0x370] sm:$0xff] %v1409_v49  ;;  %1412 = vst [vmem:[%s2304_s6 + $0x378] sm:$0xff] %v1411_v50 }
 0x16f PF: > { %s13_s16 = sadd.s32 1, %s1715_s16   ;;  %s2453_s12 = smov %s1703_s13 }
 0x170   : > { %p10_p11 = scmp.ge.s32.totalorder %s13_s16, 4   ;;  %s2454_s13 = smov %s1780_s22 }
 0x171   : > { %s2455_s14 = smov %s1711_s15  ;;  %s2456_s15 = smov %s2458_s17 }
 0x172   :  { %12 = sbr.rel (!%p10_p11) target bundleno = 3 (0x3), region = 113 }

</bundles_post_ra>
